<compile_context>
chip_gen: v6e
topology: v6e:2x2x1
jax: 0.10.0
libtpu: 0.0.40
codegen_flags: <defaults>
</compile_context>

<pallas_src>
import functools

import jax
import jax.numpy as jnp
from jax import lax
from jax.experimental import pallas as pl
from jax.experimental.pallas import tpu as pltpu

TEMPERATURE = 0.07
BASE_TEMPERATURE = 0.07
ADV_WEIGHT = 1.0  # args.adv_weight


# ----------------------------- kernel --------------------------------------- #
def _supcon_fused_kernel(labr_ref, labc_ref, invden_ref, w_ref, feat_ref,
                         out_ref, z_ref, *, batch_size, tile_m,
                         inv_temperature, adv_weight):
    i = pl.program_id(0)
    n = 2 * batch_size

    # ---- tile 0: fused info_proj (Conv1d kernel_size=1) + accumulator init ----
    # The grid axis is sequential ("arbitrary"), so Z is projected exactly once
    # into the persistent VMEM scratch and reused by every row tile.
    @pl.when(i == 0)
    def _init():
        f = feat_ref[...]                                      # (B, C, D)
        # out[v, b, d] = sum_c W[v, c, 0] * f[b, c, d]  (VPU mul + sublane reduce;
        # the projection is tiny: M=2, K=50 would starve the MXU anyway).
        z_ref[0:batch_size, :] = jnp.sum(f * w_ref[0], axis=1)  # view 0 rows
        z_ref[batch_size:, :] = jnp.sum(f * w_ref[1], axis=1)   # view 1 rows
        out_ref[...] = jnp.zeros_like(out_ref)

    # ---- row tile of the Gram / log-softmax stage ------------------------------
    z = z_ref[...]                                             # (n, D) contrast_feature
    r0 = pl.multiple_of(i * tile_m, tile_m)
    zt = z_ref[pl.ds(r0, tile_m), :]                           # (tile_m, D) anchors

    # anchor_dot_contrast for this row tile (f32 MXU matmul, contraction over D).
    # TODO(synk): optional bf16 operands for v6e/v7x MXU rate; kept f32 for exactness.
    s = lax.dot_general(zt, z, (((1,), (1,)), ((), ())),
                        preferred_element_type=jnp.float32) * inv_temperature

    # Predicates built from (tile_m,1)/(1,n) iotas and int32 labels; no full
    # [n,n] f32/int32 mask buffers are materialized - they are fused via where().
    row_ids = r0 + lax.broadcasted_iota(jnp.int32, (tile_m, 1), 0)
    col_ids = lax.broadcasted_iota(jnp.int32, (1, n), 1)
    not_self = row_ids != col_ids                              # logits_mask
    pos = jnp.logical_and(labr_ref[...] == labc_ref[...], not_self)   # mask

    # Numerically stable log-softmax with the self column excluded from BOTH the
    # max and the denominator.  log_prob is shift-invariant, so this is exactly
    # the torch computation, but it cannot produce log(0) = -inf / 0*inf = NaN
    # when the diagonal dominates (the bug in the previous version).
    neg_big = jnp.float32(-1e30)
    s_m = jnp.where(not_self, s, neg_big)
    logits = s_m - jnp.max(s_m, axis=1, keepdims=True)
    denom = jnp.sum(jnp.where(not_self, jnp.exp(logits), 0.0),
                    axis=1, keepdims=True)                     # >= 1 by construction
    log_prob = logits - jnp.log(denom)
    ls = jnp.where(pos, log_prob, 0.0)                         # mask * log_prob (NaN free)

    top_row = row_ids < batch_size                             # (tile_m, 1) anchor view 0
    right_col = col_ids >= batch_size                          # (1, n) contrast view 1

    # Row sums of mix_square:
    #   top rows   : left block * 1 + right block * adv_weight
    #   bottom rows: left block replaced by adv_weight * ls[:B, B:]^T (handled via
    #                the transposed cross term below), right block * 1
    ls_left = jnp.sum(jnp.where(right_col, 0.0, ls), axis=1, keepdims=True)
    ls_right = jnp.sum(jnp.where(right_col, ls, 0.0), axis=1, keepdims=True)
    row_mix = jnp.where(top_row, ls_left + adv_weight * ls_right, ls_right)

    den_rows = jnp.sum(pos.astype(jnp.float32), axis=1, keepdims=True)   # mask.sum(1)

    # Cross term: sum_{i>=B} adv_w * sum_{q<B} ls[q,i] / den[i] re-indexed onto the
    # TOP rows with the precomputed column-side 1/den vector, so row tiles stay
    # fully independent (no cross-tile [1,n] accumulator).
    cross = jnp.sum(jnp.where(right_col, ls * invden_ref[...], 0.0),
                    axis=1, keepdims=True)
    per_row = row_mix / den_rows + jnp.where(top_row, adv_weight * cross, 0.0)

    out_ref[...] += jnp.sum(per_row, keepdims=True)            # sum_i mean_log_prob_pos[i]


# ----------------------------- wrapper -------------------------------------- #
def _pick_row_tile(n, cap=512):
    if n <= cap or n % 8 != 0:
        return n
    t = min(cap, n)
    t -= t % 8
    while t >= 8:
        if n % t == 0:
            return t
        t -= 8
    return n


def supcon_loss(features, labels, conv_weight, *, temperature=TEMPERATURE,
                base_temperature=BASE_TEMPERATURE, adv_weight=ADV_WEIGHT):
    """ori_SupConLoss.forward (labels path, stop_grad=False, contrast_mode='all')."""
    features = features.astype(jnp.float32)                    # [B, C, D] native layout
    b, c, d = features.shape
    n = 2 * b
    w = conv_weight.astype(jnp.float32)                        # [2, C, 1] native Conv1d weight

    lab = labels.astype(jnp.int32).reshape(b)                  # exact int compare
    lab2 = jnp.concatenate([lab, lab], axis=0)                 # labels for both views
    lab_rows = lab2.reshape(n, 1)
    lab_cols = lab2.reshape(1, n)
    # closed-form positive counts: den[j] = 2*|{labels == label_j}| - 1  (lane-dense [1,n])
    counts = jnp.sum((lab[None, :] == lab[:, None]).astype(jnp.int32), axis=1)
    den = (2 * counts - 1).astype(jnp.float32)
    inv_den = (1.0 / jnp.concatenate([den, den], axis=0)).reshape(1, n)

    tile_m = _pick_row_tile(n)
    grid = (n // tile_m,)

    kernel = functools.partial(
        _supcon_fused_kernel, batch_size=b, tile_m=tile_m,
        inv_temperature=float(1.0 / temperature), adv_weight=float(adv_weight))

    # generous VMEM budget + scheduler cost hint
    vmem_bytes = 4 * (3 * b * c * d + 2 * n * d + 16 * tile_m * n + 16 * n) + (2 << 20)
    vmem_bytes = int(min(max(vmem_bytes, 8 << 20), 64 << 20))
    cost = pl.CostEstimate(
        flops=2 * n * n * d + 2 * 2 * b * c * d,
        transcendentals=n * n,
        bytes_accessed=4 * (b * c * d + 2 * c + 3 * n + 1))

    acc = pl.pallas_call(
        kernel,
        out_shape=jax.ShapeDtypeStruct((1, 1), jnp.float32),
        grid_spec=pltpu.PrefetchScalarGridSpec(
            num_scalar_prefetch=0,
            grid=grid,
            in_specs=[
                pl.BlockSpec((tile_m, 1), lambda i: (i, 0)),     # row labels (tiled)
                pl.BlockSpec((1, n), lambda i: (0, 0)),          # column labels
                pl.BlockSpec((1, n), lambda i: (0, 0)),          # 1/den per column
                pl.BlockSpec((2, c, 1), lambda i: (0, 0, 0)),    # conv1d weight (native)
                pl.BlockSpec((b, c, d), lambda i: (0, 0, 0)),    # features (native, resident)
            ],
            out_specs=pl.BlockSpec((1, 1), lambda i: (0, 0)),    # scalar accumulator
            scratch_shapes=[pltpu.VMEM((n, d), jnp.float32)],    # Z = contrast_feature
        ),
        compiler_params=pltpu.CompilerParams(
            dimension_semantics=("arbitrary",),                  # accumulator axis
            vmem_limit_bytes=vmem_bytes),
        cost_estimate=cost,
    )(lab_rows, lab_cols, inv_den, w, features)

    scale = -(temperature / base_temperature) / n               # mean over 2B anchors
    return scale * acc[0, 0]


# ----------------------------- pure-JAX reference --------------------------- #
def supcon_loss_ref(features, labels, conv_weight, temperature=TEMPERATURE,
                    base_temperature=BASE_TEMPERATURE, adv_weight=ADV_WEIGHT):
    w = conv_weight[:, :, 0].astype(jnp.float32)
    feats = jnp.einsum('vc,bcd->bvd', w, features.astype(jnp.float32))   # info_proj
    b = feats.shape[0]
    cf = jnp.concatenate([feats[:, 0, :], feats[:, 1, :]], axis=0)       # [2B, D]
    lab = labels.reshape(-1, 1)
    mask0 = (lab == lab.T).astype(jnp.float32)
    adc = cf @ cf.T / temperature
    logits = adc - jnp.max(adc, axis=1, keepdims=True)
    mask = jnp.tile(mask0, (2, 2))
    logits_mask = 1.0 - jnp.eye(2 * b, dtype=jnp.float32)
    mask = mask * logits_mask
    exp_logits = jnp.exp(logits) * logits_mask
    log_prob = logits - jnp.log(exp_logits.sum(1, keepdims=True))
    ls = mask * log_prob
    ac = ls[:b, b:]
    # NOTE: matches torch for adv_weight == 1.0 (the torch code's in-place view
    # aliasing would square adv_weight on the bottom-left block otherwise).
    mix = ls.at[:b, b:].set(ac * adv_weight).at[b:, :b].set(ac.T * adv_weight)
    mean_lp = mix.sum(1) / mask.sum(1)
    loss = -(temperature / base_temperature) * mean_lp
    return loss.reshape(2, b).mean()


# TODO(synk): stop_grad / .detach() branches only change gradients (forward value
#             identical); autodiff stop-gradient semantics are not expressed here.
# TODO(synk): the labels=None (SimCLR eye mask) and explicit-`mask` paths of the
#             module are not implemented; only the supervised labels path is.

if __name__ == "__main__":
    key = jax.random.PRNGKey(0)
    kf, kl, kw = jax.random.split(key, 3)
    B, C, D = 8, 50, 32                      # features: [bsz, 50 (conv in-channels), feat_len]
    # moderate feature scale keeps exp() well conditioned in f32 (T=0.07 amplifies logits ~14x)
    features = 0.1 * jax.random.normal(kf, (B, C, D), dtype=jnp.float32)
    labels = jax.random.randint(kl, (B,), 0, 4)
    # nn.Conv1d(50, 2, kernel_size=1, bias=False) weight, shape [2, 50, 1]
    conv_w = jax.random.normal(kw, (2, C, 1), dtype=jnp.float32) / jnp.sqrt(jnp.float32(C))

    loss_fn = jax.jit(supcon_loss)
    loss = jax.block_until_ready(loss_fn(features, labels, conv_w))

    ref = supcon_loss_ref(features, labels, conv_w)
    assert bool(jnp.isfinite(loss)), loss
    assert abs(float(loss) - float(ref)) <= 5e-3 * max(1.0, abs(float(ref))), \
        (float(loss), float(ref))
    print("KERNEL_OK")
</pallas_src>

<mosaic_0001>
module attributes {stable_mosaic.version = 11 : i64} {
  func.func @_supcon_fused_kernel(%arg0: i32, %arg1: memref<16x1xi32, #tpu.memory_space<vmem>>, %arg2: memref<1x16xi32, #tpu.memory_space<vmem>>, %arg3: memref<1x16xf32, #tpu.memory_space<vmem>>, %arg4: memref<2x50x1xf32, #tpu.memory_space<vmem>>, %arg5: memref<8x50x32xf32, #tpu.memory_space<vmem>>, %arg6: memref<1x1xf32, #tpu.memory_space<vmem>>, %arg7: memref<16x32xf32, #tpu.memory_space<vmem>>) attributes {dimension_semantics = [#tpu.dimension_semantics<arbitrary>], iteration_bounds = array<i64: 1>, scalar_prefetch = 0 : i64, scratch_operands = 1 : i64, tpu.core_type = #tpu.core_type<tc>, window_params = [{transform_indices = @transform_0, window_bounds = array<i64: 16, 1>}, {pipeline_mode = #tpu.pipeline_mode<synchronous>, transform_indices = @transform_1, window_bounds = array<i64: 1, 16>}, {pipeline_mode = #tpu.pipeline_mode<synchronous>, transform_indices = @transform_2, window_bounds = array<i64: 1, 16>}, {pipeline_mode = #tpu.pipeline_mode<synchronous>, transform_indices = @transform_3, window_bounds = array<i64: 2, 50, 1>}, {pipeline_mode = #tpu.pipeline_mode<synchronous>, transform_indices = @transform_4, window_bounds = array<i64: 8, 50, 32>}, {pipeline_mode = #tpu.pipeline_mode<synchronous>, transform_indices = @transform_5, window_bounds = array<i64: 1, 1>}]} {
    %c0_i32 = arith.constant 0 : i32
    %0 = arith.cmpi eq, %arg0, %c0_i32 : i32
    %1 = arith.extui %0 : i1 to i32
    %c0_i32_0 = arith.constant 0 : i32
    %2 = arith.cmpi ne, %1, %c0_i32_0 : i32
    scf.if %2 {
      %c0_31 = arith.constant 0 : index
      %c0_32 = arith.constant 0 : index
      %c0_33 = arith.constant 0 : index
      %87 = vector.load %arg5[%c0_31, %c0_32, %c0_33] : memref<8x50x32xf32, #tpu.memory_space<vmem>>, vector<8x50x32xf32>
      %c0_34 = arith.constant 0 : index
      %c0_35 = arith.constant 0 : index
      %c0_36 = arith.constant 0 : index
      %88 = vector.load %arg4[%c0_34, %c0_35, %c0_36] : memref<2x50x1xf32, #tpu.memory_space<vmem>>, vector<1x50x1xf32>
      %89 = vector.shape_cast %88 : vector<1x50x1xf32> to vector<50x1xf32>
      %90 = vector.shape_cast %89 : vector<50x1xf32> to vector<1x50x1xf32>
      %91 = vector.broadcast %90 : vector<1x50x1xf32> to vector<8x50x32xf32>
      %92 = arith.mulf %87, %91 : vector<8x50x32xf32>
      %cst_37 = arith.constant dense<0.000000e+00> : vector<8x32xf32>
      %93 = vector.multi_reduction <add>, %92, %cst_37 [1] : vector<8x50x32xf32> to vector<8x32xf32>
      %c0_38 = arith.constant 0 : index
      %c0_39 = arith.constant 0 : index
      %94 = vector.load %arg7[%c0_38, %c0_39] : memref<16x32xf32, #tpu.memory_space<vmem>>, vector<8x32xf32>
      tpu.vector_store %arg7[%c0_38, %c0_39], %93 {strides = array<i32>} : memref<16x32xf32, #tpu.memory_space<vmem>>, vector<8x32xf32>,
      %c1 = arith.constant 1 : index
      %c0_40 = arith.constant 0 : index
      %c0_41 = arith.constant 0 : index
      %95 = vector.load %arg4[%c1, %c0_40, %c0_41] : memref<2x50x1xf32, #tpu.memory_space<vmem>>, vector<1x50x1xf32>
      %96 = vector.shape_cast %95 : vector<1x50x1xf32> to vector<50x1xf32>
      %97 = vector.shape_cast %96 : vector<50x1xf32> to vector<1x50x1xf32>
      %98 = vector.broadcast %97 : vector<1x50x1xf32> to vector<8x50x32xf32>
      %99 = arith.mulf %87, %98 : vector<8x50x32xf32>
      %cst_42 = arith.constant dense<0.000000e+00> : vector<8x32xf32>
      %100 = vector.multi_reduction <add>, %99, %cst_42 [1] : vector<8x50x32xf32> to vector<8x32xf32>
      %c8 = arith.constant 8 : index
      %c0_43 = arith.constant 0 : index
      %101 = vector.load %arg7[%c8, %c0_43] : memref<16x32xf32, #tpu.memory_space<vmem>>, vector<8x32xf32>
      tpu.vector_store %arg7[%c8, %c0_43], %100 {strides = array<i32>} : memref<16x32xf32, #tpu.memory_space<vmem>>, vector<8x32xf32>,
      %cst_44 = arith.constant 0.000000e+00 : f32
      %102 = vector.broadcast %cst_44 : f32 to vector<1x1xf32>
      %c0_45 = arith.constant 0 : index
      %c0_46 = arith.constant 0 : index
      %103 = vector.load %arg6[%c0_45, %c0_46] : memref<1x1xf32, #tpu.memory_space<vmem>>, vector<1x1xf32>
      tpu.vector_store %arg6[%c0_45, %c0_46], %102 {strides = array<i32>} : memref<1x1xf32, #tpu.memory_space<vmem>>, vector<1x1xf32>,
    } else {
    }
    %c0 = arith.constant 0 : index
    %c0_1 = arith.constant 0 : index
    %3 = vector.load %arg7[%c0, %c0_1] : memref<16x32xf32, #tpu.memory_space<vmem>>, vector<16x32xf32>
    %c16_i32 = arith.constant 16 : i32
    %4 = arith.muli %arg0, %c16_i32 : i32
    %5 = tpu.assume_multiple %4, 16 : i32
    %6 = arith.index_cast %5 : i32 to index
    %c0_2 = arith.constant 0 : index
    %7 = vector.load %arg7[%6, %c0_2] : memref<16x32xf32, #tpu.memory_space<vmem>>, vector<16x32xf32>
    %cst = arith.constant dense<0.000000e+00> : vector<16x16xf32>
    %8 = tpu.matmul %7, %3, %cst {dimension_numbers = #tpu.dot_dimension_numbers<[1], [1], [0], [0], [0, 0, 1, 0], [], []>} : vector<16x32xf32>, vector<16x32xf32>, vector<16x16xf32> -> vector<16x16xf32>
    %cst_3 = arith.constant 14.2857141 : f32
    %9 = vector.broadcast %cst_3 : f32 to vector<16x16xf32>
    %10 = arith.mulf %8, %9 : vector<16x16xf32>
    %11 = tpu.iota {dimensions = array<i32: 0>} : vector<16x1xi32>
    %12 = vector.broadcast %5 : i32 to vector<16x1xi32>
    %13 = arith.addi %12, %11 : vector<16x1xi32>
    %14 = tpu.iota {dimensions = array<i32: 1>} : vector<1x16xi32>
    %15 = vector.broadcast %13 : vector<16x1xi32> to vector<16x16xi32>
    %16 = vector.broadcast %14 : vector<1x16xi32> to vector<16x16xi32>
    %17 = arith.cmpi ne, %15, %16 : vector<16x16xi32>
    %c0_4 = arith.constant 0 : index
    %c0_5 = arith.constant 0 : index
    %18 = vector.load %arg1[%c0_4, %c0_5] : memref<16x1xi32, #tpu.memory_space<vmem>>, vector<16x1xi32>
    %c0_6 = arith.constant 0 : index
    %c0_7 = arith.constant 0 : index
    %19 = vector.load %arg2[%c0_6, %c0_7] : memref<1x16xi32, #tpu.memory_space<vmem>>, vector<1x16xi32>
    %20 = vector.broadcast %18 : vector<16x1xi32> to vector<16x16xi32>
    %21 = vector.broadcast %19 : vector<1x16xi32> to vector<16x16xi32>
    %22 = arith.cmpi eq, %20, %21 : vector<16x16xi32>
    %23 = arith.andi %22, %17 : vector<16x16xi1>
    %cst_8 = arith.constant -1.000000e+30 : f32
    %24 = vector.broadcast %cst_8 : f32 to vector<16x16xf32>
    %25 = arith.select %17, %10, %24 : vector<16x16xi1>, vector<16x16xf32>
    %cst_9 = arith.constant dense<0xFF800000> : vector<16xf32>
    %26 = vector.multi_reduction <maximumf>, %25, %cst_9 [1] : vector<16x16xf32> to vector<16xf32>
    %27 = vector.shape_cast %26 : vector<16xf32> to vector<16x1xf32>
    %28 = vector.broadcast %27 : vector<16x1xf32> to vector<16x16xf32>
    %29 = arith.subf %25, %28 : vector<16x16xf32>
    %30 = math.exp %29 : vector<16x16xf32>
    %cst_10 = arith.constant 0.000000e+00 : f32
    %31 = vector.broadcast %cst_10 : f32 to vector<16x16xf32>
    %32 = arith.select %17, %30, %31 : vector<16x16xi1>, vector<16x16xf32>
    %cst_11 = arith.constant dense<0.000000e+00> : vector<16xf32>
    %33 = vector.multi_reduction <add>, %32, %cst_11 [1] : vector<16x16xf32> to vector<16xf32>
    %34 = vector.shape_cast %33 : vector<16xf32> to vector<16x1xf32>
    %35 = math.log %34 : vector<16x1xf32>
    %36 = vector.broadcast %35 : vector<16x1xf32> to vector<16x16xf32>
    %37 = arith.subf %29, %36 : vector<16x16xf32>
    %cst_12 = arith.constant 0.000000e+00 : f32
    %38 = vector.broadcast %cst_12 : f32 to vector<16x16xf32>
    %39 = arith.select %23, %37, %38 : vector<16x16xi1>, vector<16x16xf32>
    %c8_i32 = arith.constant 8 : i32
    %40 = vector.broadcast %c8_i32 : i32 to vector<16x1xi32>
    %41 = arith.cmpi slt, %13, %40 : vector<16x1xi32>
    %c8_i32_13 = arith.constant 8 : i32
    %42 = vector.broadcast %c8_i32_13 : i32 to vector<1x16xi32>
    %43 = arith.cmpi sge, %14, %42 : vector<1x16xi32>
    %cst_14 = arith.constant 0.000000e+00 : f32
    %44 = vector.shape_cast %43 : vector<1x16xi1> to vector<1x16xi1>
    %45 = vector.broadcast %44 : vector<1x16xi1> to vector<16x16xi1>
    %46 = vector.broadcast %cst_14 : f32 to vector<16x16xf32>
    %47 = arith.select %45, %46, %39 : vector<16x16xi1>, vector<16x16xf32>
    %cst_15 = arith.constant dense<0.000000e+00> : vector<16xf32>
    %48 = vector.multi_reduction <add>, %47, %cst_15 [1] : vector<16x16xf32> to vector<16xf32>
    %49 = vector.shape_cast %48 : vector<16xf32> to vector<16x1xf32>
    %cst_16 = arith.constant 0.000000e+00 : f32
    %50 = vector.shape_cast %43 : vector<1x16xi1> to vector<1x16xi1>
    %51 = vector.broadcast %50 : vector<1x16xi1> to vector<16x16xi1>
    %52 = vector.broadcast %cst_16 : f32 to vector<16x16xf32>
    %53 = arith.select %51, %39, %52 : vector<16x16xi1>, vector<16x16xf32>
    %cst_17 = arith.constant dense<0.000000e+00> : vector<16xf32>
    %54 = vector.multi_reduction <add>, %53, %cst_17 [1] : vector<16x16xf32> to vector<16xf32>
    %55 = vector.shape_cast %54 : vector<16xf32> to vector<16x1xf32>
    %cst_18 = arith.constant 1.000000e+00 : f32
    %56 = vector.broadcast %cst_18 : f32 to vector<16x1xf32>
    %57 = arith.mulf %56, %55 : vector<16x1xf32>
    %58 = arith.addf %49, %57 : vector<16x1xf32>
    %59 = arith.select %41, %58, %55 : vector<16x1xi1>, vector<16x1xf32>
    %60 = arith.extui %23 : vector<16x16xi1> to vector<16x16xi32>
    %61 = arith.sitofp %60 : vector<16x16xi32> to vector<16x16xf32>
    %cst_19 = arith.constant dense<0.000000e+00> : vector<16xf32>
    %62 = vector.multi_reduction <add>, %61, %cst_19 [1] : vector<16x16xf32> to vector<16xf32>
    %63 = vector.shape_cast %62 : vector<16xf32> to vector<16x1xf32>
    %c0_20 = arith.constant 0 : index
    %c0_21 = arith.constant 0 : index
    %64 = vector.load %arg3[%c0_20, %c0_21] : memref<1x16xf32, #tpu.memory_space<vmem>>, vector<1x16xf32>
    %65 = vector.broadcast %64 : vector<1x16xf32> to vector<16x16xf32>
    %66 = arith.mulf %39, %65 : vector<16x16xf32>
    %cst_22 = arith.constant 0.000000e+00 : f32
    %67 = vector.shape_cast %43 : vector<1x16xi1> to vector<1x16xi1>
    %68 = vector.broadcast %67 : vector<1x16xi1> to vector<16x16xi1>
    %69 = vector.broadcast %cst_22 : f32 to vector<16x16xf32>
    %70 = arith.select %68, %66, %69 : vector<16x16xi1>, vector<16x16xf32>
    %cst_23 = arith.constant dense<0.000000e+00> : vector<16xf32>
    %71 = vector.multi_reduction <add>, %70, %cst_23 [1] : vector<16x16xf32> to vector<16xf32>
    %72 = vector.shape_cast %71 : vector<16xf32> to vector<16x1xf32>
    %73 = arith.divf %59, %63 : vector<16x1xf32>
    %cst_24 = arith.constant 1.000000e+00 : f32
    %74 = vector.broadcast %cst_24 : f32 to vector<16x1xf32>
    %75 = arith.mulf %74, %72 : vector<16x1xf32>
    %cst_25 = arith.constant 0.000000e+00 : f32
    %76 = vector.broadcast %cst_25 : f32 to vector<16x1xf32>
    %77 = arith.select %41, %75, %76 : vector<16x1xi1>, vector<16x1xf32>
    %78 = arith.addf %73, %77 : vector<16x1xf32>
    %c0_26 = arith.constant 0 : index
    %c0_27 = arith.constant 0 : index
    %79 = vector.load %arg6[%c0_26, %c0_27] : memref<1x1xf32, #tpu.memory_space<vmem>>, vector<1x1xf32>
    %80 = vector.shape_cast %78 : vector<16x1xf32> to vector<1x16x1xf32>
    %cst_28 = arith.constant dense<0.000000e+00> : vector<1xf32>
    %81 = vector.multi_reduction <add>, %80, %cst_28 [1, 2] : vector<1x16x1xf32> to vector<1xf32>
    %82 = vector.shape_cast %81 : vector<1xf32> to vector<1x1x1xf32>
    %83 = vector.extract %82[0, 0, 0] : f32 from vector<1x1x1xf32>
    %84 = vector.broadcast %83 : f32 to vector<1x1xf32>
    %85 = arith.addf %79, %84 : vector<1x1xf32>
    %c0_29 = arith.constant 0 : index
    %c0_30 = arith.constant 0 : index
    %86 = vector.load %arg6[%c0_29, %c0_30] : memref<1x1xf32, #tpu.memory_space<vmem>>, vector<1x1xf32>
    tpu.vector_store %arg6[%c0_29, %c0_30], %85 {strides = array<i32>} : memref<1x1xf32, #tpu.memory_space<vmem>>, vector<1x1xf32>,
    return
  }
  func.func @transform_0(%arg0: i32) -> (i32, i32) {
    %c0_i32 = arith.constant 0 : i32
    %c0_i32_0 = arith.constant 0 : i32
    return %arg0, %c0_i32 : i32, i32
  }
  func.func @transform_1(%arg0: i32) -> (i32, i32) {
    %c0_i32 = arith.constant 0 : i32
    %c0_i32_0 = arith.constant 0 : i32
    %c0_i32_1 = arith.constant 0 : i32
    return %c0_i32, %c0_i32_0 : i32, i32
  }
  func.func @transform_2(%arg0: i32) -> (i32, i32) {
    %c0_i32 = arith.constant 0 : i32
    %c0_i32_0 = arith.constant 0 : i32
    %c0_i32_1 = arith.constant 0 : i32
    return %c0_i32, %c0_i32_0 : i32, i32
  }
  func.func @transform_3(%arg0: i32) -> (i32, i32, i32) {
    %c0_i32 = arith.constant 0 : i32
    %c0_i32_0 = arith.constant 0 : i32
    %c0_i32_1 = arith.constant 0 : i32
    %c0_i32_2 = arith.constant 0 : i32
    return %c0_i32, %c0_i32_0, %c0_i32_1 : i32, i32, i32
  }
  func.func @transform_4(%arg0: i32) -> (i32, i32, i32) {
    %c0_i32 = arith.constant 0 : i32
    %c0_i32_0 = arith.constant 0 : i32
    %c0_i32_1 = arith.constant 0 : i32
    %c0_i32_2 = arith.constant 0 : i32
    return %c0_i32, %c0_i32_0, %c0_i32_1 : i32, i32, i32
  }
  func.func @transform_5(%arg0: i32) -> (i32, i32) {
    %c0_i32 = arith.constant 0 : i32
    %c0_i32_0 = arith.constant 0 : i32
    %c0_i32_1 = arith.constant 0 : i32
    return %c0_i32, %c0_i32_0 : i32, i32
  }
}

</mosaic_0001>

<bundles_post_ra>
// kernel: supcon_loss.1
= control target key start
LH: loop header
LB: loop body
LE: loop exit
PB: predicated region body
PF: predicated region fallthrough
CT: control target
= control target key end

     0   :  { %v940_v2 = vmov 0   ;;  %s1661_s0 = inlined_call_operand.vmem [shape: s32[16,1], index: 0, kind: input, shape index: {}]   ;;  %s1662_s1 = inlined_call_operand.vmem [shape: s32[1,16], index: 1, kind: input, shape index: {}]   ;;  %s1663_s2 = inlined_call_operand.vmem [shape: f32[1,16], index: 2, kind: input, shape index: {}]   ;;  %s1664_s3 = inlined_call_operand.vmem [shape: f32[2,50,1], index: 3, kind: input, shape index: {}]   ;;  %s1665_s4 = inlined_call_operand.vmem [shape: f32[8,50,32], index: 4, kind: input, shape index: {}]   ;;  %s1666_s5 = inlined_call_operand.hbm [shape: f32[1,1], index: 5, kind: output, shape index: {}]  }
   0x1   :  { %v875_v0 = vld [vmem:[%s1664_s3 + $0x48] sm:$0xff]  ;;  %v873_v1 = vld [vmem:[%s1664_s3 + $0x38] sm:$0xff]  ;;  %905 = vset.pattern.permute.xlu1 %v940_v2  ;;  %904 = vset.pattern.permute.xlu0 %v940_v2  ;;  %v874_v3 = vld [vmem:[%s1664_s3 + $0x40] sm:$0xff] }
   0x2   :  { %377 = vperm.xlu1 %905, %v875_v0   ;;  %367 = vperm.xlu0 %904, %v873_v1   ;;  %v81_v4 = vld [vmem:[%s1664_s3] sm:$0xff]  ;;  %v82_v5 = vld [vmem:[%s1664_s3 + $0x8] sm:$0xff]  ;;  %v876_v6 = vld [vmem:[%s1664_s3 + $0x50] sm:$0xff] }
   0x3   :  { %v83_v7 = vld [vmem:[%s1664_s3 + $0x10] sm:$0xff]  ;;  %v877_v8 = vld [vmem:[%s1664_s3 + $0x58] sm:$0xff] }
   0x6   :  { %372 = vperm.xlu0 %904, %v874_v3   ;;  %90 = vperm.xlu1 %905, %v81_v4  }
   0xa   :  { %95 = vperm.xlu0 %904, %v82_v5   ;;  %382 = vperm.xlu1 %905, %v876_v6  }
   0xb   :  { %10 = vsyncpa [#allocation4], 0  ;;  %v84_v9 = vld [vmem:[%s1664_s3 + $0x18] sm:$0xff]  ;;  %v878_v10 = vld [vmem:[%s1664_s3 + $0x60] sm:$0xff]  ;;  %vm179_vm0 = vcmask 261120   ;;  %vm191_vm1 = vcmask 254976  }
   0xc   :  { %v85_v11 = vld [vmem:[%s1664_s3 + $0x20] sm:$0xff]  ;;  %v879_v12 = vld [vmem:[%s1664_s3 + $0x68] sm:$0x3]  ;;  %v87_v14 = vld [vmem:[%s1664_s3 + $0x30] sm:$0x3]  ;;  %vm341_vm2 = vcmask 1041409  }
   0xd   :  { %v86_v13 = vld [vmem:[%s1664_s3 + $0x28] sm:$0xff]  ;;  %v1018_v15 = vld [vmem:[%s1665_s4 + $0x10] sm:$0xff]  ;;  %v1028_v17 = vld [vmem:[%s1665_s4 + $0x80] sm:$0xff]  ;;  %vm343_vm3 = vcmask 1042434   ;;  %vm345_vm4 = vcmask 1043459   ;;  %vm347_vm5 = vcmask 1044484  }
   0xe   :  { %100 = vperm.xlu0 %904, %v83_v7   ;;  %387 = vperm.xlu1 %905, %v877_v8   ;;  %v1023_v16 = vld [vmem:[%s1665_s4 + $0x48] sm:$0xff]  ;;  %v1033_v18 = vld [vmem:[%s1665_s4 + $0xb8] sm:$0xff]  ;;  %v1038_v19 = vld [vmem:[%s1665_s4 + $0xf0] sm:$0xff]  ;;  %vm349_vm6 = vcmask 1045509   ;;  %vm351_vm7 = vcmask 1046534   ;;  %vm353_vm8 = vcmask 1047559  }
   0xf   :  { %v1043_v20 = vld [vmem:[%s1665_s4 + $0x128] sm:$0xff]  ;;  %v1048_v21 = vld [vmem:[%s1665_s4 + $0x160] sm:$0xff]  ;;  %v1053_v22 = vld [vmem:[%s1665_s4 + $0x198] sm:$0xff]  ;;  %vm752_vm10 = vcmask 130048   ;;  %vm625_vm12 = vcmask 0  }
  0x10   :  { %v1062_v29 = vld [vmem:[%s1665_s4] sm:$0xff]  ;;  %v1067_v30 = vld [vmem:[%s1665_s4 + $0x38] sm:$0xff]  ;;  %v1072_v31 = vld [vmem:[%s1665_s4 + $0x70] sm:$0xff] }
  0x11   :  { %v1081_v36 = vld [vmem:[%s1665_s4 + $0xa8] sm:$0xff]  ;;  %v1086_v37 = vld [vmem:[%s1665_s4 + $0xe0] sm:$0xff]  ;;  %v1091_v38 = vld [vmem:[%s1665_s4 + $0x118] sm:$0xff] }
  0x12   :  { %105 = vperm.xlu0 %904, %v84_v9   ;;  %392 = vperm.xlu1 %905, %v878_v10   ;;  %v67_v43 = vld [vmem:[%s1665_s4 + $0x150] sm:$0xff]  ;;  %v74_v44 = vld [vmem:[%s1665_s4 + $0x188] sm:$0xff]  ;;  %v1135_v54 = vld [vmem:[%s1665_s4 + $0x40] sm:$0xff] }
  0x13   :  { %v1130_v53 = vld [vmem:[%s1665_s4 + $0x8] sm:$0xff]  ;;  %v1140_v55 = vld [vmem:[%s1665_s4 + $0x78] sm:$0xff]  ;;  %v47_v61 = vld [vmem:[%s1665_s4 + $0xb0] sm:$0xff] }
  0x14   :  { %v54_v62 = vld [vmem:[%s1665_s4 + $0xe8] sm:$0xff]  ;;  %v61_v63 = vld [vmem:[%s1665_s4 + $0x120] sm:$0xff]  ;;  %v68_v4 = vld [vmem:[%s1665_s4 + $0x158] sm:$0xff] }
  0x15   :  { %v75_v5 = vld [vmem:[%s1665_s4 + $0x190] sm:$0xff] }
  0x16   :  { %110 = vperm.xlu0 %904, %v85_v11   ;;  %397 = vperm.xlu1 %905, %v879_v12  }
  0x1a   :  { %115 = vperm.xlu0 %904, %v86_v13   ;;  %120 = vperm.xlu1 %905, %v87_v14  }
  0x7d   :  { %v378_v23 = vpop.permute.xlu1 %377  ;;  %v368_v24 = vpop.permute.xlu0 %367 }
  0x7e   :  { %v402_v25 = vmul.f32 %v378_v23, %v1018_v15  ;;  %v409_v26 = vmul.f32 %v378_v23, %v1023_v16  ;;  %v416_v27 = vmul.f32 %v378_v23, %v1028_v17  ;;  %v423_v28 = vmul.f32 %v378_v23, %v1033_v18 }
  0x7f   :  { %v430_v32 = vmul.f32 %v378_v23, %v1038_v19  ;;  %v437_v33 = vmul.f32 %v378_v23, %v1043_v20  ;;  %v444_v34 = vmul.f32 %v378_v23, %v1048_v21  ;;  %v451_v35 = vmul.f32 %v378_v23, %v1053_v22 }
  0x80   :  { %v1094_v39 = vsel %vm179_vm0, %v402_v25, 0.0  ;;  %v1097_v40 = vsel %vm179_vm0, %v409_v26, 0.0  ;;  %v1100_v41 = vsel %vm179_vm0, %v416_v27, 0.0  ;;  %v1103_v42 = vsel %vm179_vm0, %v423_v28, 0.0 }
  0x81   :  { %v1112_v45 = vsel %vm179_vm0, %v430_v32, 0.0  ;;  %v1115_v46 = vsel %vm179_vm0, %v437_v33, 0.0  ;;  %v1118_v47 = vsel %vm179_vm0, %v444_v34, 0.0  ;;  %v1121_v48 = vsel %vm179_vm0, %v451_v35, 0.0  ;;  %v373_v60 = vpop.permute.xlu0 %372 }
  0x82   :  { %v400_v49 = vmul.f32 %v368_v24, %v1062_v29  ;;  %v407_v50 = vmul.f32 %v368_v24, %v1067_v30  ;;  %v414_v51 = vmul.f32 %v368_v24, %v1072_v31  ;;  %v421_v52 = vmul.f32 %v368_v24, %v1081_v36 }
  0x83   :  { %v428_v56 = vmul.f32 %v368_v24, %v1086_v37  ;;  %v435_v57 = vmul.f32 %v368_v24, %v1091_v38  ;;  %v442_v58 = vmul.f32 %v368_v24, %v67_v43  ;;  %v449_v59 = vmul.f32 %v368_v24, %v74_v44 }
  0x84   :  { %v456_v0 = vsel %vm179_vm0, %v400_v49, 0.0  ;;  %v475_v1 = vsel %vm179_vm0, %v407_v50, 0.0  ;;  %v494_v2 = vsel %vm179_vm0, %v414_v51, 0.0  ;;  %v513_v3 = vsel %vm179_vm0, %v421_v52, 0.0  ;;  %v91_v50 = vpop.permute.xlu1 %90 }
  0x85   :  { %v532_v6 = vsel %vm179_vm0, %v428_v56, 0.0  ;;  %v551_v7 = vsel %vm179_vm0, %v435_v57, 0.0  ;;  %v570_v8 = vsel %vm179_vm0, %v442_v58, 0.0  ;;  %v589_v9 = vsel %vm179_vm0, %v449_v59, 0.0 }
  0x86   :  { %v401_v10 = vmul.f32 %v373_v60, %v1130_v53  ;;  %v408_v11 = vmul.f32 %v373_v60, %v1135_v54  ;;  %v415_v12 = vmul.f32 %v373_v60, %v1140_v55  ;;  %v422_v13 = vmul.f32 %v373_v60, %v47_v61 }
  0x87   :  { %v429_v14 = vmul.f32 %v373_v60, %v54_v62  ;;  %v436_v23 = vmul.f32 %v373_v60, %v61_v63  ;;  %v443_v24 = vmul.f32 %v373_v60, %v68_v4  ;;  %v450_v25 = vmul.f32 %v373_v60, %v75_v5 }
  0x88   :  { %v457_v26 = vsel %vm179_vm0, %v401_v10, 0.0  ;;  %v476_v27 = vsel %vm179_vm0, %v408_v11, 0.0  ;;  %v495_v28 = vsel %vm179_vm0, %v415_v12, 0.0  ;;  %v514_v32 = vsel %vm179_vm0, %v422_v13, 0.0 }
  0x89   :  { %v1174_v33 = vadd.f32 %v457_v26, %v456_v0  ;;  %v1176_v34 = vadd.f32 %v476_v27, %v475_v1  ;;  %v1178_v35 = vadd.f32 %v495_v28, %v494_v2  ;;  %v1180_v49 = vadd.f32 %v514_v32, %v513_v3  ;;  %v1214_v28 = vld [vmem:[%s1665_s4 + $0x18] sm:$0xff] }
  0x8a   :  { %v533_v51 = vsel %vm179_vm0, %v429_v14, 0.0  ;;  %v552_v52 = vsel %vm179_vm0, %v436_v23, 0.0  ;;  %v571_v56 = vsel %vm179_vm0, %v443_v24, 0.0  ;;  %v590_v57 = vsel %vm179_vm0, %v450_v25, 0.0 }
  0x8b   :  { %v1186_v58 = vadd.f32 %v533_v51, %v532_v6  ;;  %v1188_v59 = vadd.f32 %v552_v52, %v551_v7  ;;  %v1190_v60 = vadd.f32 %v571_v56, %v570_v8  ;;  %v1192_v0 = vadd.f32 %v590_v57, %v589_v9  ;;  %v96_v7 = vpop.permute.xlu0 %95  ;;  %v383_v51 = vpop.permute.xlu1 %382  ;;  %v1241_v52 = vld [vmem:[%s1665_s4 + $0xc0] sm:$0xff]  ;;  %v1246_v56 = vld [vmem:[%s1665_s4 + $0xf8] sm:$0xff]  ;;  %v1251_v57 = vld [vmem:[%s1665_s4 + $0x130] sm:$0xff] }
  0x8c   :  { %v123_v1 = vmul.f32 %v91_v50, %v1062_v29  ;;  %v130_v2 = vmul.f32 %v91_v50, %v1067_v30  ;;  %v137_v3 = vmul.f32 %v91_v50, %v1072_v31  ;;  %v144_v10 = vmul.f32 %v91_v50, %v1081_v36 }
  0x8d   :  { %v151_v11 = vmul.f32 %v91_v50, %v1086_v37  ;;  %v158_v12 = vmul.f32 %v91_v50, %v1091_v38  ;;  %v165_v6 = vmul.f32 %v91_v50, %v67_v43  ;;  %v172_v13 = vmul.f32 %v91_v50, %v74_v44 }
  0x8e   :  { %v180_v8 = vsel %vm179_vm0, %v123_v1, 0.0  ;;  %v200_v9 = vsel %vm179_vm0, %v130_v2, 0.0  ;;  %v219_v14 = vsel %vm179_vm0, %v137_v3, 0.0  ;;  %v238_v29 = vsel %vm179_vm0, %v144_v10, 0.0 }
  0x8f   :  { %v257_v30 = vsel %vm179_vm0, %v151_v11, 0.0  ;;  %v276_v31 = vsel %vm179_vm0, %v158_v12, 0.0  ;;  %v295_v36 = vsel %vm179_vm0, %v165_v6, 0.0  ;;  %v314_v37 = vsel %vm179_vm0, %v172_v13, 0.0  ;;  %v1260_v11 = vld [vmem:[%s1665_s4 + $0x168] sm:$0xff]  ;;  %v1265_v12 = vld [vmem:[%s1665_s4 + $0x1a0] sm:$0xff] }
  0x90   :  { %v124_v38 = vmul.f32 %v96_v7, %v1130_v53  ;;  %v131_v43 = vmul.f32 %v96_v7, %v1135_v54  ;;  %v138_v44 = vmul.f32 %v96_v7, %v1140_v55  ;;  %v145_v23 = vmul.f32 %v96_v7, %v47_v61  ;;  %v1223_v55 = vld [vmem:[%s1665_s4 + $0x50] sm:$0xff]  ;;  %v1228_v61 = vld [vmem:[%s1665_s4 + $0x88] sm:$0xff] }
  0x91   :  { %v152_v24 = vmul.f32 %v96_v7, %v54_v62  ;;  %v159_v25 = vmul.f32 %v96_v7, %v61_v63  ;;  %v166_v26 = vmul.f32 %v96_v7, %v68_v4  ;;  %v173_v27 = vmul.f32 %v96_v7, %v75_v5 }
  0x92   :  { %v181_v32 = vsel %vm179_vm0, %v124_v38, 0.0  ;;  %v201_v50 = vsel %vm179_vm0, %v131_v43, 0.0  ;;  %v220_v53 = vsel %vm179_vm0, %v138_v44, 0.0  ;;  %v239_v54 = vsel %vm179_vm0, %v145_v23, 0.0 }
  0x93   :  { %v1230_v62 = vadd.f32 %v181_v32, %v180_v8  ;;  %v1232_v63 = vadd.f32 %v201_v50, %v200_v9  ;;  %v1234_v4 = vadd.f32 %v220_v53, %v219_v14  ;;  %v1236_v5 = vadd.f32 %v239_v54, %v238_v29 }
  0x94   :  { %v258_v1 = vsel %vm179_vm0, %v152_v24, 0.0  ;;  %v277_v2 = vsel %vm179_vm0, %v159_v25, 0.0  ;;  %v296_v3 = vsel %vm179_vm0, %v166_v26, 0.0  ;;  %v315_v10 = vsel %vm179_vm0, %v173_v27, 0.0 }
  0x95   :  { %v1267_v6 = vadd.f32 %v258_v1, %v257_v30  ;;  %v1269_v13 = vadd.f32 %v277_v2, %v276_v31  ;;  %v1271_v7 = vadd.f32 %v296_v3, %v295_v36  ;;  %v1273_v8 = vadd.f32 %v315_v10, %v314_v37 }
  0x96   :  { %v403_v9 = vmul.f32 %v383_v51, %v1214_v28  ;;  %v410_v14 = vmul.f32 %v383_v51, %v1223_v55  ;;  %v417_v29 = vmul.f32 %v383_v51, %v1228_v61  ;;  %v424_v38 = vmul.f32 %v383_v51, %v1241_v52 }
  0x97   :  { %v431_v43 = vmul.f32 %v383_v51, %v1246_v56  ;;  %v438_v44 = vmul.f32 %v383_v51, %v1251_v57  ;;  %v445_v30 = vmul.f32 %v383_v51, %v1260_v11  ;;  %v452_v31 = vmul.f32 %v383_v51, %v1265_v12 }
  0x98   :  { %v460_v36 = vadd.f32 %v1094_v39, %v1174_v33  ;;  %v461_v37 = vsel %vm179_vm0, %v403_v9, 0.0  ;;  %v479_v23 = vadd.f32 %v1097_v40, %v1176_v34  ;;  %v480_v24 = vsel %vm179_vm0, %v410_v14, 0.0  ;;  %v101_v40 = vpop.permute.xlu0 %100 }
  0x99   :  { %v498_v25 = vadd.f32 %v1100_v41, %v1178_v35  ;;  %v499_v26 = vsel %vm179_vm0, %v417_v29, 0.0  ;;  %v517_v27 = vadd.f32 %v1103_v42, %v1180_v49  ;;  %v518_v32 = vsel %vm179_vm0, %v424_v38, 0.0 }
  0x9a   :  { %v462_v50 = vadd.f32 %v461_v37, %v460_v36  ;;  %v481_v53 = vadd.f32 %v480_v24, %v479_v23  ;;  %v536_v39 = vadd.f32 %v1112_v45, %v1186_v58  ;;  %v537_v33 = vsel %vm179_vm0, %v431_v43, 0.0  ;;  %v388_v43 = vpop.permute.xlu1 %387  ;;  %v1360_v36 = vld [vmem:[%s1665_s4 + $0x170] sm:$0xff]  ;;  %v1365_v37 = vld [vmem:[%s1665_s4 + $0x1a8] sm:$0xff] }
  0x9b   :  { %v500_v34 = vadd.f32 %v499_v26, %v498_v25  ;;  %v519_v54 = vadd.f32 %v518_v32, %v517_v27  ;;  %v555_v41 = vadd.f32 %v1115_v46, %v1188_v59  ;;  %v556_v35 = vsel %vm179_vm0, %v438_v44, 0.0  ;;  %v1341_v44 = vld [vmem:[%s1665_s4 + $0xc8] sm:$0xff] }
  0x9c   :  { %v538_v51 = vadd.f32 %v537_v33, %v536_v39  ;;  %v574_v42 = vadd.f32 %v1118_v47, %v1190_v60  ;;  %v575_v49 = vsel %vm179_vm0, %v445_v30, 0.0  ;;  %v593_v1 = vadd.f32 %v1121_v48, %v1192_v0  ;;  %v1346_v30 = vld [vmem:[%s1665_s4 + $0x100] sm:$0xff] }
  0x9d   :  { %v557_v45 = vadd.f32 %v556_v35, %v555_v41  ;;  %v594_v58 = vsel %vm179_vm0, %v452_v31, 0.0  ;;  %v125_v2 = vmul.f32 %v101_v40, %v1018_v15  ;;  %v132_v3 = vmul.f32 %v101_v40, %v1023_v16  ;;  %v1318_v15 = vld [vmem:[%s1665_s4 + $0x20] sm:$0xff] }
  0x9e   :  { %v576_v10 = vadd.f32 %v575_v49, %v574_v42  ;;  %v595_v46 = vadd.f32 %v594_v58, %v593_v1  ;;  %v139_v59 = vmul.f32 %v101_v40, %v1028_v17  ;;  %v146_v9 = vmul.f32 %v101_v40, %v1033_v18 }
  0x9f   :  { %v153_v47 = vmul.f32 %v101_v40, %v1038_v19  ;;  %v160_v60 = vmul.f32 %v101_v40, %v1043_v20  ;;  %v167_v14 = vmul.f32 %v101_v40, %v1048_v21  ;;  %v174_v48 = vmul.f32 %v101_v40, %v1053_v22  ;;  %v1327_v19 = vld [vmem:[%s1665_s4 + $0x58] sm:$0xff]  ;;  %v1332_v20 = vld [vmem:[%s1665_s4 + $0x90] sm:$0xff] }
  0xa0   :  { %v183_v16 = vsel %vm179_vm0, %v125_v2, 0.0  ;;  %v203_v0 = vsel %vm179_vm0, %v132_v3, 0.0  ;;  %v222_v17 = vsel %vm179_vm0, %v139_v59, 0.0  ;;  %v241_v18 = vsel %vm179_vm0, %v146_v9, 0.0  ;;  %v106_v3 = vpop.permute.xlu0 %105 }
  0xa1   :  { %v184_v21 = vadd.f32 %v183_v16, %v1230_v62  ;;  %v204_v22 = vadd.f32 %v203_v0, %v1232_v63  ;;  %v223_v29 = vadd.f32 %v222_v17, %v1234_v4  ;;  %v242_v38 = vadd.f32 %v241_v18, %v1236_v5  ;;  %v1351_v62 = vld [vmem:[%s1665_s4 + $0x138] sm:$0xff] }
  0xa2   :  { %v260_v63 = vsel %vm179_vm0, %v153_v47, 0.0  ;;  %v279_v4 = vsel %vm179_vm0, %v160_v60, 0.0  ;;  %v298_v5 = vsel %vm179_vm0, %v167_v14, 0.0  ;;  %v317_v31 = vsel %vm179_vm0, %v174_v48, 0.0 }
  0xa3   :  { %v261_v23 = vadd.f32 %v260_v63, %v1267_v6  ;;  %v280_v24 = vadd.f32 %v279_v4, %v1269_v13  ;;  %v299_v25 = vadd.f32 %v298_v5, %v1271_v7  ;;  %v318_v26 = vadd.f32 %v317_v31, %v1273_v8  ;;  %v1417_v4 = vld [vmem:[%s1665_s4 + $0xd0] sm:$0xff]  ;;  %v1422_v5 = vld [vmem:[%s1665_s4 + $0x108] sm:$0xff]  ;;  %v1427_v31 = vld [vmem:[%s1665_s4 + $0x140] sm:$0xff] }
  0xa4   :  { %v404_v27 = vmul.f32 %v388_v43, %v1318_v15  ;;  %v411_v32 = vmul.f32 %v388_v43, %v1327_v19  ;;  %v418_v39 = vmul.f32 %v388_v43, %v1332_v20  ;;  %v425_v33 = vmul.f32 %v388_v43, %v1341_v44 }
  0xa5   :  { %v432_v40 = vmul.f32 %v388_v43, %v1346_v30  ;;  %v439_v41 = vmul.f32 %v388_v43, %v1351_v62  ;;  %v446_v6 = vmul.f32 %v388_v43, %v1360_v36  ;;  %v453_v13 = vmul.f32 %v388_v43, %v1365_v37 }
  0xa6   :  { %v463_v7 = vsel %vm179_vm0, %v404_v27, 0.0  ;;  %v482_v8 = vsel %vm179_vm0, %v411_v32, 0.0  ;;  %v501_v35 = vsel %vm179_vm0, %v418_v39, 0.0  ;;  %v520_v42 = vsel %vm179_vm0, %v425_v33, 0.0  ;;  %v1436_v27 = vld [vmem:[%s1665_s4 + $0x178] sm:$0xff]  ;;  %v1441_v32 = vld [vmem:[%s1665_s4 + $0x1b0] sm:$0xff] }
  0xa7   :  { %v464_v49 = vadd.f32 %v463_v7, %v462_v50  ;;  %v483_v1 = vadd.f32 %v482_v8, %v481_v53  ;;  %v502_v58 = vadd.f32 %v501_v35, %v500_v34  ;;  %v521_v2 = vadd.f32 %v520_v42, %v519_v54 }
  0xa8   :  { %v539_v59 = vsel %vm179_vm0, %v432_v40, 0.0  ;;  %v558_v9 = vsel %vm179_vm0, %v439_v41, 0.0  ;;  %v577_v47 = vsel %vm179_vm0, %v446_v6, 0.0  ;;  %v596_v60 = vsel %vm179_vm0, %v453_v13, 0.0 }
  0xa9   :  { %v540_v14 = vadd.f32 %v539_v59, %v538_v51  ;;  %v559_v48 = vadd.f32 %v558_v9, %v557_v45  ;;  %v578_v16 = vadd.f32 %v577_v47, %v576_v10  ;;  %v597_v0 = vadd.f32 %v596_v60, %v595_v46  ;;  %v1398_v51 = vld [vmem:[%s1665_s4 + $0x28] sm:$0xff]  ;;  %v393_v46 = vpop.permute.xlu1 %392 }
  0xaa   :  { %v126_v17 = vmul.f32 %v106_v3, %v1214_v28  ;;  %v133_v50 = vmul.f32 %v106_v3, %v1223_v55  ;;  %v140_v53 = vmul.f32 %v106_v3, %v1228_v61  ;;  %v147_v34 = vmul.f32 %v106_v3, %v1241_v52 }
  0xab   :  { %v154_v54 = vmul.f32 %v106_v3, %v1246_v56  ;;  %v161_v18 = vmul.f32 %v106_v3, %v1251_v57  ;;  %v168_v43 = vmul.f32 %v106_v3, %v1260_v11  ;;  %v175_v63 = vmul.f32 %v106_v3, %v1265_v12  ;;  %v1407_v56 = vld [vmem:[%s1665_s4 + $0x60] sm:$0xff]  ;;  %v1412_v57 = vld [vmem:[%s1665_s4 + $0x98] sm:$0xff] }
  0xac   :  { %v185_v28 = vsel %vm179_vm0, %v126_v17, 0.0  ;;  %v205_v55 = vsel %vm179_vm0, %v133_v50, 0.0  ;;  %v224_v61 = vsel %vm179_vm0, %v140_v53, 0.0  ;;  %v243_v52 = vsel %vm179_vm0, %v147_v34, 0.0  ;;  %v111_v50 = vpop.permute.xlu0 %110 }
  0xad   :  { %v186_v11 = vadd.f32 %v185_v28, %v184_v21  ;;  %v206_v12 = vadd.f32 %v205_v55, %v204_v22  ;;  %v225_v45 = vadd.f32 %v224_v61, %v223_v29  ;;  %v244_v10 = vadd.f32 %v243_v52, %v242_v38 }
  0xae   :  { %v262_v21 = vsel %vm179_vm0, %v154_v54, 0.0  ;;  %v281_v22 = vsel %vm179_vm0, %v161_v18, 0.0  ;;  %v300_v29 = vsel %vm179_vm0, %v168_v43, 0.0  ;;  %v319_v38 = vsel %vm179_vm0, %v175_v63, 0.0 }
  0xaf   :  { %v263_v39 = vadd.f32 %v262_v21, %v261_v23  ;;  %v282_v33 = vadd.f32 %v281_v22, %v280_v24  ;;  %v301_v40 = vadd.f32 %v300_v29, %v299_v25  ;;  %v320_v41 = vadd.f32 %v319_v38, %v318_v26  ;;  %v398_v22 = vpop.permute.xlu1 %397  ;;  %v1502_v29 = vld [vmem:[%s1665_s4 + $0x110] sm:$0x3]  ;;  %v1507_v38 = vld [vmem:[%s1665_s4 + $0x148] sm:$0x3] }
  0xb0   :  { %v405_v6 = vmul.f32 %v393_v46, %v1398_v51  ;;  %v412_v13 = vmul.f32 %v393_v46, %v1407_v56  ;;  %v419_v7 = vmul.f32 %v393_v46, %v1412_v57  ;;  %v426_v8 = vmul.f32 %v393_v46, %v1417_v4 }
  0xb1   :  { %v433_v35 = vmul.f32 %v393_v46, %v1422_v5  ;;  %v440_v42 = vmul.f32 %v393_v46, %v1427_v31  ;;  %v447_v3 = vmul.f32 %v393_v46, %v1436_v27  ;;  %v454_v59 = vmul.f32 %v393_v46, %v1441_v32 }
  0xb2   :  { %v465_v23 = vsel %vm179_vm0, %v405_v6, 0.0  ;;  %v484_v24 = vsel %vm179_vm0, %v412_v13, 0.0  ;;  %v503_v25 = vsel %vm179_vm0, %v419_v7, 0.0  ;;  %v522_v26 = vsel %vm179_vm0, %v426_v8, 0.0  ;;  %v1521_v13 = vld [vmem:[%s1665_s4 + $0x1b8] sm:$0x3] }
  0xb3   :  { %v466_v9 = vadd.f32 %v465_v23, %v464_v49  ;;  %v485_v47 = vadd.f32 %v484_v24, %v483_v1  ;;  %v504_v60 = vadd.f32 %v503_v25, %v502_v58  ;;  %v523_v17 = vadd.f32 %v522_v26, %v521_v2 }
  0xb4   :  { %v541_v53 = vsel %vm179_vm0, %v433_v35, 0.0  ;;  %v560_v34 = vsel %vm179_vm0, %v440_v42, 0.0  ;;  %v579_v54 = vsel %vm179_vm0, %v447_v3, 0.0  ;;  %v598_v18 = vsel %vm179_vm0, %v454_v59, 0.0 }
  0xb5   :  { %v542_v43 = vadd.f32 %v541_v53, %v540_v14  ;;  %v561_v63 = vadd.f32 %v560_v34, %v559_v48  ;;  %v580_v28 = vadd.f32 %v579_v54, %v578_v16  ;;  %v599_v55 = vadd.f32 %v598_v18, %v597_v0  ;;  %v1470_v14 = vld [vmem:[%s1665_s4 + $0x30] sm:$0x3] }
  0xb6   :  { %v127_v61 = vmul.f32 %v111_v50, %v1318_v15  ;;  %v134_v49 = vmul.f32 %v111_v50, %v1327_v19  ;;  %v141_v1 = vmul.f32 %v111_v50, %v1332_v20  ;;  %v148_v58 = vmul.f32 %v111_v50, %v1341_v44  ;;  %v1475_v15 = vld [vmem:[%s1665_s4 + $0x68] sm:$0x3]  ;;  %v1480_v19 = vld [vmem:[%s1665_s4 + $0xa0] sm:$0x3] }
  0xb7   :  { %v155_v2 = vmul.f32 %v111_v50, %v1346_v30  ;;  %v162_v52 = vmul.f32 %v111_v50, %v1351_v62  ;;  %v169_v46 = vmul.f32 %v111_v50, %v1360_v36  ;;  %v176_v21 = vmul.f32 %v111_v50, %v1365_v37  ;;  %v1489_v36 = vld [vmem:[%s1665_s4 + $0xd8] sm:$0x3] }
  0xb8   :  { %v187_v20 = vsel %vm179_vm0, %v127_v61, 0.0  ;;  %v207_v44 = vsel %vm179_vm0, %v134_v49, 0.0  ;;  %v226_v30 = vsel %vm179_vm0, %v141_v1, 0.0  ;;  %v245_v62 = vsel %vm179_vm0, %v148_v58, 0.0 }
  0xb9   :  { %v1491_v37 = vadd.f32 %v187_v20, %v186_v11  ;;  %v1493_v48 = vadd.f32 %v207_v44, %v206_v12  ;;  %v1495_v16 = vadd.f32 %v226_v30, %v225_v45  ;;  %v1497_v0 = vadd.f32 %v245_v62, %v244_v10  ;;  %v1512_v11 = vld [vmem:[%s1665_s4 + $0x180] sm:$0x3] }
  0xba   :  { %v264_v12 = vsel %vm179_vm0, %v155_v2, 0.0  ;;  %v283_v45 = vsel %vm179_vm0, %v162_v52, 0.0  ;;  %v302_v10 = vsel %vm179_vm0, %v169_v46, 0.0  ;;  %v321_v6 = vsel %vm179_vm0, %v176_v21, 0.0 }
  0xbb   :  { %v1523_v7 = vadd.f32 %v264_v12, %v263_v39  ;;  %v1525_v8 = vadd.f32 %v283_v45, %v282_v33  ;;  %v1527_v35 = vadd.f32 %v302_v10, %v301_v40  ;;  %v1529_v42 = vadd.f32 %v321_v6, %v320_v41 }
  0xbc   :  { %v406_v3 = vmul.f32 %v398_v22, %v1470_v14  ;;  %v413_v59 = vmul.f32 %v398_v22, %v1475_v15  ;;  %v420_v23 = vmul.f32 %v398_v22, %v1480_v19  ;;  %v427_v24 = vmul.f32 %v398_v22, %v1489_v36 }
  0xbd   :  { %v434_v25 = vmul.f32 %v398_v22, %v1502_v29  ;;  %v441_v26 = vmul.f32 %v398_v22, %v1507_v38  ;;  %v448_v39 = vmul.f32 %v398_v22, %v1512_v11  ;;  %v455_v33 = vmul.f32 %v398_v22, %v1521_v13 }
  0xbe   :  { %v467_v40 = vsel %vm191_vm1, %v406_v3, 0.0  ;;  %v486_v41 = vsel %vm191_vm1, %v413_v59, 0.0  ;;  %v505_v50 = vsel %vm191_vm1, %v420_v23, 0.0  ;;  %v524_v53 = vsel %vm191_vm1, %v427_v24, 0.0 }
  0xbf   :  { %v468_v34 = vadd.f32 %v467_v40, %v466_v9  ;;  %v487_v54 = vadd.f32 %v486_v41, %v485_v47  ;;  %v506_v18 = vadd.f32 %v505_v50, %v504_v60  ;;  %v525_v61 = vadd.f32 %v524_v53, %v523_v17 }
  0xc0   :  { %v543_v49 = vsel %vm191_vm1, %v434_v25, 0.0  ;;  %v562_v1 = vsel %vm191_vm1, %v441_v26, 0.0  ;;  %v581_v58 = vsel %vm191_vm1, %v448_v39, 0.0  ;;  %v600_v2 = vsel %vm191_vm1, %v455_v33, 0.0 }
  0xc1   :  { %v469_v52 = vrot.slane %v468_v34, 4  ;;  %v488_v46 = vrot.slane %v487_v54, 4  ;;  %v507_v21 = vrot.slane %v506_v18, 4  ;;  %v526_v20 = vrot.slane %v525_v61, 4 }
  0xc2   :  { %v544_v44 = vadd.f32 %v543_v49, %v542_v43  ;;  %v563_v30 = vadd.f32 %v562_v1, %v561_v63  ;;  %v582_v62 = vadd.f32 %v581_v58, %v580_v28  ;;  %v601_v9 = vadd.f32 %v600_v2, %v599_v55 }
  0xc3   :  { %v470_v47 = vadd.f32 %v469_v52, %v468_v34  ;;  %v489_v60 = vadd.f32 %v488_v46, %v487_v54  ;;  %v508_v17 = vadd.f32 %v507_v21, %v506_v18  ;;  %v527_v22 = vadd.f32 %v526_v20, %v525_v61  ;;  %v116_v52 = vpop.permute.xlu0 %115 }
  0xc4   :  { %v545_v12 = vrot.slane %v544_v44, 4  ;;  %v564_v45 = vrot.slane %v563_v30, 4  ;;  %v583_v10 = vrot.slane %v582_v62, 4  ;;  %v602_v6 = vrot.slane %v601_v9, 4 }
  0xc5   :  { %v471_v3 = vrot.slane %v470_v47, 2  ;;  %v490_v59 = vrot.slane %v489_v60, 2  ;;  %v509_v23 = vrot.slane %v508_v17, 2  ;;  %v528_v24 = vrot.slane %v527_v22, 2 }
  0xc6   :  { %v546_v25 = vadd.f32 %v545_v12, %v544_v44  ;;  %v565_v43 = vadd.f32 %v564_v45, %v563_v30  ;;  %v584_v63 = vadd.f32 %v583_v10, %v582_v62  ;;  %v603_v28 = vadd.f32 %v602_v6, %v601_v9 }
  0xc7   :  { %v472_v55 = vadd.f32 %v471_v3, %v470_v47  ;;  %v491_v26 = vadd.f32 %v490_v59, %v489_v60  ;;  %v510_v39 = vadd.f32 %v509_v23, %v508_v17  ;;  %v529_v33 = vadd.f32 %v528_v24, %v527_v22 }
  0xc8   :  { %v547_v40 = vrot.slane %v546_v25, 2  ;;  %v566_v41 = vrot.slane %v565_v43, 2  ;;  %v585_v50 = vrot.slane %v584_v63, 2  ;;  %v604_v53 = vrot.slane %v603_v28, 2 }
  0xc9   :  { %v473_v34 = vrot.slane %v472_v55, 1  ;;  %v492_v54 = vrot.slane %v491_v26, 1  ;;  %v511_v18 = vrot.slane %v510_v39, 1  ;;  %v530_v61 = vrot.slane %v529_v33, 1 }
  0xca   :  { %v548_v49 = vadd.f32 %v547_v40, %v546_v25  ;;  %v567_v1 = vadd.f32 %v566_v41, %v565_v43  ;;  %v586_v58 = vadd.f32 %v585_v50, %v584_v63  ;;  %v605_v2 = vadd.f32 %v604_v53, %v603_v28 }
  0xcb   :  { %v474_v46 = vadd.f32 %v473_v34, %v472_v55  ;;  %v493_v21 = vadd.f32 %v492_v54, %v491_v26  ;;  %v512_v20 = vadd.f32 %v511_v18, %v510_v39  ;;  %v531_v44 = vadd.f32 %v530_v61, %v529_v33  ;;  %v121_v39 = vpop.permute.xlu1 %120 }
  0xcc   :  { %v549_v30 = vrot.slane %v548_v49, 1  ;;  %v568_v62 = vrot.slane %v567_v1, 1  ;;  %v587_v9 = vrot.slane %v586_v58, 1  ;;  %v606_v47 = vrot.slane %v605_v2, 1 }
  0xcd   :  { %v616_v60 = vsel %vm341_vm2, %v493_v21, %v474_v46  ;;  %v128_v17 = vmul.f32 %v116_v52, %v1398_v51  ;;  %v135_v22 = vmul.f32 %v116_v52, %v1407_v56  ;;  %v142_v12 = vmul.f32 %v116_v52, %v1412_v57 }
  0xce   :  { %v550_v45 = vadd.f32 %v549_v30, %v548_v49  ;;  %v569_v10 = vadd.f32 %v568_v62, %v567_v1  ;;  %v588_v6 = vadd.f32 %v587_v9, %v586_v58  ;;  %v607_v3 = vadd.f32 %v606_v47, %v605_v2 }
  0xcf   :  { %v617_v59 = vsel %vm343_vm3, %v512_v20, %v616_v60  ;;  %v149_v23 = vmul.f32 %v116_v52, %v1417_v4  ;;  %v156_v24 = vmul.f32 %v116_v52, %v1422_v5  ;;  %v163_v25 = vmul.f32 %v116_v52, %v1427_v31 }
  0xd0   :  { %v618_v43 = vsel %vm345_vm4, %v531_v44, %v617_v59  ;;  %v170_v51 = vmul.f32 %v116_v52, %v1436_v27  ;;  %v177_v56 = vmul.f32 %v116_v52, %v1441_v32  ;;  %v189_v57 = vsel %vm179_vm0, %v128_v17, 0.0 }
  0xd1   :  { %v619_v63 = vsel %vm347_vm5, %v550_v45, %v618_v43  ;;  %v190_v28 = vadd.f32 %v189_v57, %v1491_v37  ;;  %v209_v55 = vsel %vm179_vm0, %v135_v22, 0.0  ;;  %v228_v4 = vsel %vm179_vm0, %v142_v12, 0.0 }
  0xd2   :  { %v620_v5 = vsel %vm349_vm6, %v569_v10, %v619_v63  ;;  %v210_v31 = vadd.f32 %v209_v55, %v1493_v48  ;;  %v229_v26 = vadd.f32 %v228_v4, %v1495_v16  ;;  %v247_v27 = vsel %vm179_vm0, %v149_v23, 0.0 }
  0xd3   :  { %v621_v32 = vsel %vm351_vm7, %v588_v6, %v620_v5  ;;  %v248_v33 = vadd.f32 %v247_v27, %v1497_v0  ;;  %v266_v40 = vsel %vm179_vm0, %v156_v24, 0.0  ;;  %v285_v37 = vsel %vm179_vm0, %v163_v25, 0.0 }
  0xd4   :  { %v622_v41 = vsel %vm353_vm8, %v607_v3, %v621_v32  ;;  %v267_v50 = vadd.f32 %v266_v40, %v1523_v7  ;;  %v286_v53 = vadd.f32 %v285_v37, %v1525_v8  ;;  %v304_v48 = vsel %vm179_vm0, %v170_v51, 0.0 }
  0xd5   :  { %624 = vst.msk [vmem:[#allocation2 + $0x8] sm:$0xff] %vm179_vm0, %v622_v41  ;;  %v305_v16 = vadd.f32 %v304_v48, %v1527_v35  ;;  %v323_v34 = vsel %vm179_vm0, %v177_v56, 0.0  ;;  %v129_v0 = vmul.f32 %v121_v39, %v1470_v14  ;;  %v136_v54 = vmul.f32 %v121_v39, %v1475_v15 }
  0xd6   :  { %v324_v18 = vadd.f32 %v323_v34, %v1529_v42  ;;  %v143_v61 = vmul.f32 %v121_v39, %v1480_v19  ;;  %v150_v7 = vmul.f32 %v121_v39, %v1489_v36  ;;  %v157_v8 = vmul.f32 %v121_v39, %v1502_v29 }
  0xd7   :  { %v164_v49 = vmul.f32 %v121_v39, %v1507_v38  ;;  %v171_v1 = vmul.f32 %v121_v39, %v1512_v11  ;;  %v178_v35 = vmul.f32 %v121_v39, %v1521_v13  ;;  %v192_v58 = vsel %vm191_vm1, %v129_v0, 0.0 }
  0xd8   :  { %v193_v2 = vadd.f32 %v192_v58, %v190_v28  ;;  %v211_v14 = vsel %vm191_vm1, %v136_v54, 0.0  ;;  %v230_v15 = vsel %vm191_vm1, %v143_v61, 0.0  ;;  %v249_v42 = vsel %vm191_vm1, %v150_v7, 0.0 }
  0xd9   :  { %v212_v19 = vadd.f32 %v211_v14, %v210_v31  ;;  %v231_v52 = vadd.f32 %v230_v15, %v229_v26  ;;  %v250_v36 = vadd.f32 %v249_v42, %v248_v33  ;;  %v268_v29 = vsel %vm191_vm1, %v157_v8, 0.0 }
  0xda   :  { %v194_v46 = vrot.slane %v193_v2, 4  ;;  %v269_v38 = vadd.f32 %v268_v29, %v267_v50  ;;  %v287_v11 = vsel %vm191_vm1, %v164_v49, 0.0  ;;  %v306_v13 = vsel %vm191_vm1, %v171_v1, 0.0 }
  0xdb   :  { %v213_v21 = vrot.slane %v212_v19, 4  ;;  %v232_v20 = vrot.slane %v231_v52, 4  ;;  %v251_v44 = vrot.slane %v250_v36, 4  ;;  %v288_v30 = vadd.f32 %v287_v11, %v286_v53 }
  0xdc   :  { %v195_v62 = vadd.f32 %v194_v46, %v193_v2  ;;  %v270_v9 = vrot.slane %v269_v38, 4  ;;  %v307_v47 = vadd.f32 %v306_v13, %v305_v16  ;;  %v325_v60 = vsel %vm191_vm1, %v178_v35, 0.0  ;;  %v628_v17 = vld [vmem:[#allocation2 + $0x8] sm:$0xff] }
  0xdd   :  { %v214_v22 = vadd.f32 %v213_v21, %v212_v19  ;;  %v233_v12 = vadd.f32 %v232_v20, %v231_v52  ;;  %v252_v45 = vadd.f32 %v251_v44, %v250_v36  ;;  %v289_v10 = vrot.slane %v288_v30, 4  ;;  %892 = vmatprep.subr.msk.mxu0 %vm179_vm0, %v628_v17 }
  0xde   :  { %v196_v6 = vrot.slane %v195_v62, 2  ;;  %v271_v3 = vadd.f32 %v270_v9, %v269_v38  ;;  %v308_v59 = vrot.slane %v307_v47, 4  ;;  %v326_v23 = vadd.f32 %v325_v60, %v324_v18  ;;  %893 = vmatpush3.xpose.msk.msra.mxu0 %vm179_vm0, %v628_v17 }
  0xdf   :  { %v215_v24 = vrot.slane %v214_v22, 2  ;;  %v234_v25 = vrot.slane %v233_v12, 2  ;;  %v253_v43 = vrot.slane %v252_v45, 2  ;;  %v290_v51 = vadd.f32 %v289_v10, %v288_v30 }
  0xe0   :  { %v197_v56 = vadd.f32 %v196_v6, %v195_v62  ;;  %v272_v57 = vrot.slane %v271_v3, 2  ;;  %v309_v63 = vadd.f32 %v308_v59, %v307_v47  ;;  %v327_v28 = vrot.slane %v326_v23, 4  ;;  %v884_v6 = vld [vmem:[%s1662_s1] ss:$0 sm:$0xff] }
  0xe1   :  { %v216_v55 = vadd.f32 %v215_v24, %v214_v22  ;;  %v235_v4 = vadd.f32 %v234_v25, %v233_v12  ;;  %v254_v5 = vadd.f32 %v253_v43, %v252_v45  ;;  %v291_v31 = vrot.slane %v290_v51, 2 }
  0xe2   :  { %v198_v26 = vrot.slane %v197_v56, 1  ;;  %v273_v27 = vadd.f32 %v272_v57, %v271_v3  ;;  %v310_v39 = vrot.slane %v309_v63, 2  ;;  %v328_v32 = vadd.f32 %v327_v28, %v326_v23 }
  0xe3   :  { %v217_v33 = vrot.slane %v216_v55, 1  ;;  %v236_v40 = vrot.slane %v235_v4, 1  ;;  %v255_v37 = vrot.slane %v254_v5, 1  ;;  %v292_v41 = vadd.f32 %v291_v31, %v290_v51 }
  0xe4   :  { %v199_v50 = vadd.f32 %v198_v26, %v197_v56  ;;  %v274_v53 = vrot.slane %v273_v27, 1  ;;  %v311_v48 = vadd.f32 %v310_v39, %v309_v63  ;;  %v329_v16 = vrot.slane %v328_v32, 2 }
  0xe5   :  { %v218_v34 = vadd.f32 %v217_v33, %v216_v55  ;;  %v237_v0 = vadd.f32 %v236_v40, %v235_v4  ;;  %v293_v54 = vrot.slane %v292_v41, 1  ;;  %v256_v7 = vadd.f32 %v255_v37, %v254_v5  ;;  %v734_v5 = vld [vmem:[%s1661_s0 + $0x8] sm:$0xff] }
  0xe6   :  { %v312_v18 = vrot.slane %v311_v48, 1  ;;  %v330_v61 = vadd.f32 %v329_v16, %v328_v32  ;;  %v275_v49 = vadd.f32 %v274_v53, %v273_v27  ;;  %v723_v46 = vlaneseq }
  0xe7   :  { %v342_v8 = vsel %vm341_vm2, %v218_v34, %v199_v50  ;;  %v294_v58 = vadd.f32 %v293_v54, %v292_v41  ;;  %v941_v22 = vmov 0.0   ;;  %vm842_vm2 = vcmask 7168  }
  0xe8   :  { %v331_v1 = vrot.slane %v330_v61, 1  ;;  %v344_v35 = vsel %vm343_vm3, %v237_v0, %v342_v8  ;;  %v313_v14 = vadd.f32 %v312_v18, %v311_v48  ;;  %v724_v38 = vshrl.u32 %v723_v46, 7  ;;  %626 = vst.msk [vmem:[#allocation3] sm:$0x1] %vm625_vm12, %v941_v22  ;;  %v887_v48 = vld [vmem:[%s1663_s2] ss:$0 sm:$0xff] }
  0xe9   :  { %v346_v2 = vsel %vm345_vm4, %v256_v7, %v344_v35  ;;  %v1609_v13 = vand.u32 127, %v723_v46  ;;  %s942_s2 = smov [#allocation3]  }
  0xea   :  { %v348_v15 = vsel %vm347_vm5, %v275_v49, %v346_v2  ;;  %v332_v42 = vadd.f32 %v331_v1, %v330_v61  ;;  %v725_v11 = vadd.s32 8, %v724_v38  ;;  %s865_s8 = sshll.u32 %s942_s2, 4  ;;  %s866_s8 = int_to_ptr.vmem [resolvable:$true] %s865_s8 }
  0xeb   :  { %v350_v19 = vsel %vm349_vm6, %v294_v58, %v348_v15  ;;  %vm731_vm11 = vcmp.ne.s32.totalorder %v724_v38, %v1609_v13  ;;  %vm783_vm1 = vcmp.ge.s32.totalorder %v1609_v13, 8  ;;  %s918_s10 = scalar_lea.vmem %s866_s8, 16  ;;  %s922_s11 = scalar_lea.vmem %s866_s8, 32 }
  0xec   :  { %v352_v52 = vsel %vm351_vm7, %v313_v14, %v350_v19  ;;  %vm732_vm9 = vcmp.ne.s32.totalorder %v725_v11, %v1609_v13  ;;  %p919_p0 = scmp.ne.s32.totalorder %s866_s8, %s918_s10  ;;  %p923_p1 = scmp.lt.s32.totalorder %s866_s8, %s866_s8 }
  0xed   :  { %v354_v36 = vsel %vm353_vm8, %v332_v42, %v352_v52  ;;  %p924_p2 = scmp.lt.s32.totalorder %s922_s11, %s918_s10 }
  0xee   :  { %356 = vst.msk [vmem:[#allocation2] sm:$0xff] %vm179_vm0, %v354_v36 }
  0xef   :  { %p925_p3 = por %p924_p2, %p923_p1 }
  0xf1   :  { %p926_p4 = pnand %p925_p3, %p919_p0 }
  0xf5   :  { %v627_v29 = vld [vmem:[#allocation2] sm:$0xff] }
  0xf6   :  { %894 = vmatprep.subr.msk.mxu0 %vm179_vm0, %v627_v29  ;;  %896 = vmatprep.mubr.msk.f32.mxu0 %vm179_vm0, %v627_v29 }
  0xf7   :  { %895 = vmatpush3.xpose.msk.msra.mxu0 %vm179_vm0, %v627_v29 }
  0xfa   :  { %897 = vmatmul.mubr.msk.f32.vlgmr.msra.gmra.mxu0 %vm179_vm0, %v628_v17  ;;  %v733_v17 = vld [vmem:[%s1661_s0] sm:$0xff] }
 0x1ba   :  { %v898_v21 = vpop.f32.mrf.mxu0 }
 0x1bb   :  { %v722_v20 = vmul.f32 14.285714, %v898_v21 }
 0x1bc   :  { %v712_v44 = vpop.f32.mrf.mxu0 }
 0x1bd   :  { %v721_v30 = vmul.f32 14.285714, %v712_v44  ;;  %v751_v62 = vsel %vm732_vm9, %v722_v20, -1e+30 }
 0x1be   :  { %v756_v9 = vsel %vm752_vm10, %v751_v62, -inf }
 0x1bf   :  { %757 = vmax.xlane.f32.xlu1 %v756_v9  ;;  %v750_v47 = vsel %vm731_vm11, %v721_v30, -1e+30 }
 0x1c0   :  { %v753_v60 = vsel %vm752_vm10, %v750_v47, -inf }
 0x1c1   :  { %754 = vmax.xlane.f32.xlu0 %v753_v60 }
 0x1d0   :  { %737 = vperm.xlu1 %905, %v733_v17  }
 0x248   :  { %v758_v12 = vpop.xlane.xlu1 %757 }
 0x249   :  { %v760_v45 = vsub.f32 %v751_v62, %v758_v12 }
 0x24a   :  { %v755_v10 = vpop.xlane.xlu0 %754 }
 0x24b   :  { %v763_v3 = vmul.f32 1.442695, %v760_v45  ;;  %v759_v59 = vsub.f32 %v750_v47, %v755_v10 }
 0x24c   :  { %v738_v23 = vpop.permute.xlu1 %737 }
 0x24d   :  { %906 = vpow2.f32 %v763_v3  ;;  %v761_v24 = vmul.f32 1.442695, %v759_v59  ;;  %vm746_vm13 = vcmp.eq.s32.totalorder %v738_v23, %v884_v6 }
 0x24e   :  { %vm1628_vm14 = vmand %vm746_vm13, %vm731_vm11 }
 0x24f   :  { %908 = vpow2.f32 %v761_v24  ;;  %v885_v43 = vsel %vm1628_vm14, 1.0, %v941_v22 }
 0x250   :  { %v810_v51 = vsel %vm752_vm10, %v885_v43, 0.0 }
 0x251   :  { %811 = vadd.xlane.f32.xlu1 %v810_v51 }
 0x25a   :  { %v907_v56 = vpop.eup %906 }
 0x25b   :  { %v766_v57 = vsel %vm732_vm9, %v907_v56, 0.0 }
 0x25c   :  { %v909_v63 = vpop.eup %908  ;;  %v770_v28 = vsel %vm752_vm10, %v766_v57, 0.0 }
 0x25d   :  { %771 = vadd.xlane.f32.xlu0 %v770_v28  ;;  %v765_v55 = vsel %vm731_vm11, %v909_v63, 0.0 }
 0x25e   :  { %v767_v4 = vsel %vm752_vm10, %v765_v55, 0.0 }
 0x261   :  { %768 = vadd.xlane.f32.xlu0 %v767_v4 }
 0x277   :  { %740 = vperm.xlu0 %904, %v734_v5  }
 0x2da   :  { %v812_v58 = vpop.xlane.xlu1 %811 }
 0x2e6   :  { %v772_v31 = vpop.xlane.xlu0 %771 }
 0x2e7   :  { %910 = vlog2.f32 %v772_v31 }
 0x2ea   :  { %v769_v26 = vpop.xlane.xlu0 %768 }
 0x2eb   :  { %912 = vlog2.f32 %v769_v26 }
 0x2ec   :  { %914 = vrcp.f32 %v812_v58 }
 0x2f2   :  { %v741_v27 = vpop.permute.xlu0 %740 }
 0x2f3   :  { %vm747_vm15 = vcmp.eq.s32.totalorder %v741_v27, %v884_v6 }
 0x2f4   :  { %v911_v39 = vpop.eup %910  ;;  %vm749_vm0 = vmand %vm747_vm15, %vm732_vm9 }
 0x2f5   :  { %v776_v32 = vmul.f32 0.6931472, %v911_v39  ;;  %v886_v33 = vsel %vm749_vm0, 1.0, %v941_v22  ;;  %v841_v22 = vld [vmem:[#allocation3] sm:$0x1] }
 0x2f6   :  { %v813_v40 = vsel %vm752_vm10, %v886_v33, 0.0 }
 0x2f7   :  { %814 = vadd.xlane.f32.xlu0 %v813_v40  ;;  %v778_v50 = vsub.f32 %v760_v45, %v776_v32 }
 0x2f8   :  { %v913_v37 = vpop.eup %912 }
 0x2f9   :  { %v774_v41 = vmul.f32 0.6931472, %v913_v37  ;;  %v780_v34 = vsel %vm749_vm0, %v778_v50, 0.0  ;;  %v915_v19 = vpop.eup %914 }
 0x2fa   :  { %v795_v49 = vsel %vm783_vm1, %v780_v34, 0.0 }
 0x2fb   :  { %v777_v53 = vsub.f32 %v759_v59, %v774_v41  ;;  %v799_v35 = vsel %vm752_vm10, %v795_v49, 0.0 }
 0x2fd   :  { %v779_v16 = vsel %vm1628_vm14, %v777_v53, 0.0 }
 0x2fe   :  { %v786_v0 = vsel %vm783_vm1, 0.0, %v779_v16  ;;  %v794_v54 = vsel %vm783_vm1, %v779_v16, 0.0  ;;  %v823_v18 = vmul.f32 %v887_v48, %v779_v16 }
 0x2ff   :  { %v788_v61 = vsel %vm752_vm10, %v786_v0, 0.0  ;;  %v796_v7 = vsel %vm752_vm10, %v794_v54, 0.0 }
 0x300   :  { %789 = vadd.xlane.f32.xlu1 %v788_v61  ;;  %797 = vadd.xlane.f32.xlu0 %v796_v7  ;;  %v825_v8 = vsel %vm783_vm1, %v823_v18, 0.0 }
 0x301   :  { %v827_v1 = vsel %vm752_vm10, %v825_v8, 0.0 }
 0x304   :  { %828 = vadd.xlane.f32.xlu0 %v827_v1  ;;  %800 = vadd.xlane.f32.xlu1 %v799_v35 }
 0x380   :  { %v815_v2 = vpop.xlane.xlu0 %814 }
 0x381   :  { %916 = vrcp.f32 %v815_v2 }
 0x389   :  { %v790_v14 = vpop.xlane.xlu1 %789  ;;  %v798_v15 = vpop.xlane.xlu0 %797 }
 0x38a   :  { %v802_v42 = vadd.f32 %v798_v15, %v790_v14 }
 0x38c   :  { %v834_v52 = vmul.f32 %v915_v19, %v802_v42 }
 0x38d   :  { %v829_v36 = vpop.xlane.xlu0 %828  ;;  %v801_v29 = vpop.xlane.xlu1 %800 }
 0x38e   :  { %v917_v46 = vpop.eup %916  ;;  %v839_v38 = vadd.f32 %v834_v52, %v829_v36 }
 0x38f   :  { %v836_v11 = vmul.f32 %v917_v46, %v801_v29 }
 0x390   :  { %v843_v13 = vsel %vm842_vm2, %v839_v38, 0.0 }
 0x391   :  { %v844_v21 = vsel %vm842_vm2, %v836_v11, 0.0 }
 0x392   :  { %v845_v20 = vadd.f32 %v844_v21, %v843_v13 }
 0x394   :  { %846 = vadd.xlane.f32.xlu1 %v845_v20 }
 0x41d   :  { %v847_v44 = vpop.xlane.xlu1 %846 }
 0x41e   :  { %v848_v30 = vrot.slane %v847_v44, 4 }
 0x420   :  { %v849_v62 = vadd.f32 %v848_v30, %v847_v44 }
 0x422   :  { %v850_v9 = vrot.slane %v849_v62, 2 }
 0x424   :  { %v851_v47 = vadd.f32 %v850_v9, %v849_v62 }
 0x426   :  { %v852_v60 = vrot.slane %v851_v47, 1 }
 0x428   :  { %v853_v17 = vadd.f32 %v852_v60, %v851_v47 }
 0x42a   :  { %899 = vpush %v853_v17 }
 0x45b   :  { %s900_s9 = spop %899 }
 0x45c   :  { %v855_v12 = vstv %s900_s9 }
 0x45d   :  { %v856_v45 = vadd.f32 %v855_v12, %v841_v22 }
 0x45f   :  { %858 = vst.msk [vmem:[#allocation3] sm:$0x1] %vm625_vm12, %v856_v45 }
 0x460   :  { %929 = shalt.err (!%p926_p4)
}
 0x461   :  { %868 = dma.vmem_to_hbm [thread:$0]  %s866_s8, 16, %s1666_s5, [#allocation4]  }
 0x462   :  { %938 = dma.done.wait [#allocation4], 16  }
 0x463   :  { %939 = vsyncadd [#allocation4], 4294967280 }
 0x464   :  { %872 = vsyncpa [#allocation4], 1 }

</bundles_post_ra>
